<compile_context>
chip_gen: v7x
topology: tpu7x:2x2x1
jax: 0.10.0
libtpu: 0.0.40
codegen_flags: <defaults>
</compile_context>

<pallas_src>
import functools

import jax
import jax.numpy as jnp
from jax.experimental import pallas as pl
from jax.experimental.pallas import tpu as pltpu


NODE_ROW_TILE = 256   # max rows per node tile (multiple of 8, MXU-friendly)
EDGE_ROW_TILE = 256   # max rows per edge tile


def _round_up(x, m):
    return (x + m - 1) // m * m


def _silu(x):
    return x * jax.nn.sigmoid(x)


# ----------------------------------------------------------------------------
# Pallas kernels
# ----------------------------------------------------------------------------
def _embed_kernel(x_ref, w_ref, b_ref, o_ref):
    y = jnp.dot(x_ref[...], w_ref[...], preferred_element_type=jnp.float32)
    o_ref[...] = (y + b_ref[...]).astype(o_ref.dtype)


def _edge_mlp_kernel(hs_ref, he_ref, ef_ref,
                     w1s_ref, w1e_ref, w1f_ref, b1_ref, w2_ref, b2_ref, o_ref):
    # split-W1: cat([h_s, h_e, ef]) @ W1  ==  h_s@W1[:H] + h_e@W1[H:2H] + ef@W1[2H:]
    z = (jnp.dot(hs_ref[...], w1s_ref[...], preferred_element_type=jnp.float32)
         + jnp.dot(he_ref[...], w1e_ref[...], preferred_element_type=jnp.float32)
         + jnp.dot(ef_ref[...], w1f_ref[...], preferred_element_type=jnp.float32)
         + b1_ref[...])
    z = _silu(z)                                                   # f32 epilogue
    y = jnp.dot(z.astype(w2_ref.dtype), w2_ref[...],
                preferred_element_type=jnp.float32) + b2_ref[...]
    o_ref[...] = _silu(y).astype(o_ref.dtype)


def _agg_node_kernel(start_ref, msg_ref, h_ref,
                     w1h_ref, w1a_ref, b1_ref, w2_ref, b2_ref,
                     o_ref, acc_ref, *, tn, te):
    # grid = (node_tiles [parallel], edge_tiles [arbitrary / reduction, inner])
    i = pl.program_id(0)
    k = pl.program_id(1)

    @pl.when(k == 0)
    def _():
        acc_ref[...] = jnp.zeros_like(acc_ref)

    # Build the scatter one-hot tile in-kernel: S[n, e] = (start[e] == global node id).
    # Padded edges carry start == n_pad, which never matches -> no garbage scatter.
    node_ids = i * tn + jax.lax.broadcasted_iota(jnp.int32, (tn, te), 0)
    onehot = (node_ids == start_ref[...]).astype(msg_ref.dtype)    # [tn, te]
    acc_ref[...] += jnp.dot(onehot, msg_ref[...],
                            preferred_element_type=jnp.float32)    # f32 segment-sum

    @pl.when(k == pl.num_programs(1) - 1)
    def _():
        h = h_ref[...]                                             # f32 residual stream
        # split-W1: cat([h, agg]) @ W1 == h@W1[:H] + agg@W1[H:]
        z = (jnp.dot(h.astype(w1h_ref.dtype), w1h_ref[...],
                     preferred_element_type=jnp.float32)
             + jnp.dot(acc_ref[...].astype(w1a_ref.dtype), w1a_ref[...],
                       preferred_element_type=jnp.float32)
             + b1_ref[...])
        z = _silu(z)
        y = jnp.dot(z.astype(w2_ref.dtype), w2_ref[...],
                    preferred_element_type=jnp.float32) + b2_ref[...]
        o_ref[...] = (h + y).astype(o_ref.dtype)                   # node_features += node_func(x)


def _pool_linear_kernel(h_ref, w_ref, b_ref, o_ref, acc_ref, *, tn, n_real):
    i = pl.program_id(0)

    @pl.when(i == 0)
    def _():
        acc_ref[...] = jnp.zeros_like(acc_ref)

    # mask padded node rows so they do not pollute the mean pool
    row_ids = i * tn + jax.lax.broadcasted_iota(jnp.int32, h_ref.shape, 0)
    mask = (row_ids < n_real).astype(jnp.float32)
    acc_ref[...] += jnp.sum(h_ref[...] * mask, axis=0, keepdims=True)

    @pl.when(i == pl.num_programs(0) - 1)
    def _():
        pooled = acc_ref[...] * (1.0 / float(n_real))
        y = jnp.dot(pooled.astype(w_ref.dtype), w_ref[...],
                    preferred_element_type=jnp.float32) + b_ref[...]
        o_ref[...] = y.astype(o_ref.dtype)


# ----------------------------------------------------------------------------
# pallas_call wrappers
# ----------------------------------------------------------------------------
def embed_linear(x, w, b, *, tile, compute_dtype):
    m, din = x.shape
    _, h = w.shape
    return pl.pallas_call(
        _embed_kernel,
        out_shape=jax.ShapeDtypeStruct((m, h), jnp.float32),
        grid=(m // tile,),
        in_specs=[
            pl.BlockSpec((tile, din), lambda i: (i, 0)),
            pl.BlockSpec((din, h), lambda i: (0, 0)),      # weight resident
            pl.BlockSpec((1, h), lambda i: (0, 0)),
        ],
        out_specs=pl.BlockSpec((tile, h), lambda i: (i, 0)),
        compiler_params=pltpu.CompilerParams(dimension_semantics=("parallel",)),
    )(x.astype(compute_dtype), w.astype(compute_dtype),
      b.reshape(1, h).astype(jnp.float32))


def edge_mlp(hs, he, ef, w1, b1, w2, b2, *, tile, compute_dtype):
    e, h = hs.shape
    de = ef.shape[1]
    w1s = w1[:h].astype(compute_dtype)
    w1e = w1[h:2 * h].astype(compute_dtype)
    w1f = w1[2 * h:].astype(compute_dtype)
    return pl.pallas_call(
        _edge_mlp_kernel,
        out_shape=jax.ShapeDtypeStruct((e, h), compute_dtype),
        grid=(e // tile,),
        in_specs=[
            pl.BlockSpec((tile, h), lambda i: (i, 0)),
            pl.BlockSpec((tile, h), lambda i: (i, 0)),
            pl.BlockSpec((tile, de), lambda i: (i, 0)),
            pl.BlockSpec((h, h), lambda i: (0, 0)),        # weights resident
            pl.BlockSpec((h, h), lambda i: (0, 0)),
            pl.BlockSpec((de, h), lambda i: (0, 0)),
            pl.BlockSpec((1, h), lambda i: (0, 0)),
            pl.BlockSpec((h, h), lambda i: (0, 0)),
            pl.BlockSpec((1, h), lambda i: (0, 0)),
        ],
        out_specs=pl.BlockSpec((tile, h), lambda i: (i, 0)),
        compiler_params=pltpu.CompilerParams(dimension_semantics=("parallel",)),
    )(hs, he, ef, w1s, w1e, w1f,
      b1.reshape(1, h).astype(jnp.float32),
      w2.astype(compute_dtype), b2.reshape(1, h).astype(jnp.float32))


def agg_node_update(start_s, msg, h, w1, b1, w2, b2, *, tn, te, compute_dtype):
    n_pad, hd = h.shape
    e_pad = msg.shape[0]
    w1h = w1[:hd].astype(compute_dtype)
    w1a = w1[hd:].astype(compute_dtype)
    kernel = functools.partial(_agg_node_kernel, tn=tn, te=te)
    return pl.pallas_call(
        kernel,
        out_shape=jax.ShapeDtypeStruct((n_pad, hd), jnp.float32),
        grid=(n_pad // tn, e_pad // te),
        in_specs=[
            pl.BlockSpec((1, te), lambda i, k: (0, k)),     # scatter indices (int32)
            pl.BlockSpec((te, hd), lambda i, k: (k, 0)),    # messages
            pl.BlockSpec((tn, hd), lambda i, k: (i, 0)),    # residual h (aliased to output)
            pl.BlockSpec((hd, hd), lambda i, k: (0, 0)),    # weights resident
            pl.BlockSpec((hd, hd), lambda i, k: (0, 0)),
            pl.BlockSpec((1, hd), lambda i, k: (0, 0)),
            pl.BlockSpec((hd, hd), lambda i, k: (0, 0)),
            pl.BlockSpec((1, hd), lambda i, k: (0, 0)),
        ],
        out_specs=pl.BlockSpec((tn, hd), lambda i, k: (i, 0)),
        scratch_shapes=[pltpu.VMEM((tn, hd), jnp.float32)],
        input_output_aliases={2: 0},                        # update h in place
        compiler_params=pltpu.CompilerParams(
            dimension_semantics=("parallel", "arbitrary")),
    )(start_s, msg, h,
      w1h, w1a, b1.reshape(1, hd).astype(jnp.float32),
      w2.astype(compute_dtype), b2.reshape(1, hd).astype(jnp.float32))


def pool_linear(h, w, b, *, tile, n_real, compute_dtype):
    n_pad, hd = h.shape
    _, dout = w.shape
    kernel = functools.partial(_pool_linear_kernel, tn=tile, n_real=n_real)
    return pl.pallas_call(
        kernel,
        out_shape=jax.ShapeDtypeStruct((1, dout), jnp.float32),
        grid=(n_pad // tile,),
        in_specs=[
            pl.BlockSpec((tile, hd), lambda i: (i, 0)),
            pl.BlockSpec((hd, dout), lambda i: (0, 0)),
            pl.BlockSpec((1, dout), lambda i: (0, 0)),
        ],
        out_specs=pl.BlockSpec((1, dout), lambda i: (0, 0)),
        scratch_shapes=[pltpu.VMEM((1, hd), jnp.float32)],
        compiler_params=pltpu.CompilerParams(dimension_semantics=("arbitrary",)),
    )(h, w.astype(compute_dtype), b.reshape(1, dout).astype(jnp.float32))


# ----------------------------------------------------------------------------
# Parameter construction (deterministic, PyTorch Linear-style uniform init).
# Weights stored as [in_features, out_features] (transposed vs torch).
# ----------------------------------------------------------------------------
def _init_linear(key, fan_in, fan_out):
    kw, kb = jax.random.split(key)
    bound = 1.0 / jnp.sqrt(fan_in)
    w = jax.random.uniform(kw, (fan_in, fan_out), jnp.float32, -bound, bound)
    b = jax.random.uniform(kb, (fan_out,), jnp.float32, -bound, bound)
    return w, b


def init_gnn_params(key, node_dim, edge_dim, hidden_dim, output_dim, num_blocks):
    keys = jax.random.split(key, 2 + 4 * num_blocks)
    params = {}
    params["emb_w"], params["emb_b"] = _init_linear(keys[0], node_dim, hidden_dim)
    blocks = []
    for i in range(num_blocks):
        k0, k1, k2, k3 = keys[1 + 4 * i: 5 + 4 * i]
        blk = {}
        blk["e_w1"], blk["e_b1"] = _init_linear(k0, 2 * hidden_dim + edge_dim, hidden_dim)
        blk["e_w2"], blk["e_b2"] = _init_linear(k1, hidden_dim, hidden_dim)
        blk["n_w1"], blk["n_b1"] = _init_linear(k2, 2 * hidden_dim, hidden_dim)
        blk["n_w2"], blk["n_b2"] = _init_linear(k3, hidden_dim, hidden_dim)
        blocks.append(blk)
    params["blocks"] = blocks
    # TODO(synk): OutputMLP definition was not provided; 'default_pool' implemented
    # as mean-pool over nodes followed by a single Linear(hidden_dim, output_dim).
    params["out_w"], params["out_b"] = _init_linear(keys[-1], hidden_dim, output_dim)
    return params


# ----------------------------------------------------------------------------
# Forward pass (index plumbing in JAX, compute in Pallas)
# ----------------------------------------------------------------------------
def gnn_forward(params, nodes, edge_indices, edge_features, *, compute_dtype=jnp.float32):
    start = edge_indices[0].astype(jnp.int32)
    end = edge_indices[1].astype(jnp.int32)
    n = nodes.shape[0]
    e = edge_features.shape[0]
    hdim = params["emb_w"].shape[1]
    del hdim  # (documentation only)

    # row tiles (multiples of 8); pad row counts once, keep padding through all blocks
    tn = min(NODE_ROW_TILE, _round_up(n, 8))
    te = min(EDGE_ROW_TILE, _round_up(e, 8))
    n_pad = _round_up(n, tn)
    e_pad = _round_up(e, te)

    nodes_p = jnp.pad(nodes, ((0, n_pad - n), (0, 0)))
    ef_p = jnp.pad(edge_features, ((0, e_pad - e), (0, 0))).astype(compute_dtype)
    start_g = jnp.pad(start, (0, e_pad - e))                        # gather idx (pad -> 0, harmless)
    end_g = jnp.pad(end, (0, e_pad - e))
    # scatter idx: padded edges point at node id n_pad -> never matches any row tile
    start_s = jnp.pad(start, (0, e_pad - e), constant_values=n_pad).reshape(1, e_pad)

    # node embeddings (residual stream kept in f32)
    h = embed_linear(nodes_p, params["emb_w"], params["emb_b"],
                     tile=tn, compute_dtype=compute_dtype)          # [n_pad, H] f32

    for blk in params["blocks"]:
        h_c = h.astype(compute_dtype)
        hs = jnp.take(h_c, start_g, axis=0)                         # [e_pad, H] (JAX gather glue)
        he = jnp.take(h_c, end_g, axis=0)
        # edge_func: (split-W1 Linear) -> SiLU -> Linear -> SiLU, fused & row-tiled
        msg = edge_mlp(hs, he, ef_p, blk["e_w1"], blk["e_b1"], blk["e_w2"], blk["e_b2"],
                       tile=te, compute_dtype=compute_dtype)        # [e_pad, H]
        # infer_edges = False -> skip infer_edges_func branch
        # TODO(synk): aggregate_message definition not provided; implemented as
        # sum-scatter of messages to `start` nodes (fused one-hot MXU segment-sum).
        h = agg_node_update(start_s, msg, h, blk["n_w1"], blk["n_b1"],
                            blk["n_w2"], blk["n_b2"],
                            tn=tn, te=te, compute_dtype=compute_dtype)  # [n_pad, H] f32

    # OutputMLP ('default_pool'): masked mean pool (padded rows excluded) + Linear
    out = pool_linear(h, params["out_w"], params["out_b"],
                      tile=tn, n_real=n, compute_dtype=compute_dtype)   # [1, output_dim]
    return out


# ----------------------------------------------------------------------------
# Pure-JAX reference (for correctness check)
# ----------------------------------------------------------------------------
def gnn_reference(params, nodes, edge_indices, edge_features):
    start, end = edge_indices[0], edge_indices[1]
    num_nodes = nodes.shape[0]
    h = nodes @ params["emb_w"] + params["emb_b"]
    for blk in params["blocks"]:
        x = jnp.concatenate([h[start], h[end], edge_features], axis=1)
        m = _silu(x @ blk["e_w1"] + blk["e_b1"])
        m = _silu(m @ blk["e_w2"] + blk["e_b2"])
        agg = jax.ops.segment_sum(m, start, num_segments=num_nodes)
        x2 = jnp.concatenate([h, agg], axis=1)
        upd = _silu(x2 @ blk["n_w1"] + blk["n_b1"]) @ blk["n_w2"] + blk["n_b2"]
        h = h + upd
    pooled = jnp.mean(h, axis=0, keepdims=True)
    return pooled @ params["out_w"] + params["out_b"]


if __name__ == "__main__":
    # small synthetic graph
    NODE_DIM, EDGE_DIM, HIDDEN_DIM = 8, 4, 32
    NUM_NODES, NUM_EDGES = 16, 32
    OUTPUT_DIM, NUM_BLOCKS = 1, 2

    key = jax.random.PRNGKey(0)
    k_par, k_nodes, k_edges, k_ei = jax.random.split(key, 4)

    params = init_gnn_params(k_par, NODE_DIM, EDGE_DIM, HIDDEN_DIM, OUTPUT_DIM, NUM_BLOCKS)
    nodes = jax.random.normal(k_nodes, (NUM_NODES, NODE_DIM), jnp.float32)
    edge_features = jax.random.normal(k_edges, (NUM_EDGES, EDGE_DIM), jnp.float32)
    edge_indices = jax.random.randint(k_ei, (2, NUM_EDGES), 0, NUM_NODES, jnp.int32)

    ref = gnn_reference(params, nodes, edge_indices, edge_features)

    # f32 compute path: tight correctness check
    fwd_f32 = jax.jit(functools.partial(gnn_forward, compute_dtype=jnp.float32))
    out_f32 = jax.block_until_ready(fwd_f32(params, nodes, edge_indices, edge_features))
    assert out_f32.shape == (1, OUTPUT_DIM)
    assert jnp.allclose(out_f32, ref, atol=1e-3, rtol=1e-3), (out_f32, ref)

    # bf16-at-MXU path (f32 accumulation / epilogues): loose sanity check
    fwd_bf16 = jax.jit(functools.partial(gnn_forward, compute_dtype=jnp.bfloat16))
    out_bf16 = jax.block_until_ready(fwd_bf16(params, nodes, edge_indices, edge_features))
    assert out_bf16.shape == (1, OUTPUT_DIM)
    assert jnp.all(jnp.isfinite(out_bf16))
    assert jnp.allclose(out_bf16, ref, atol=2e-1, rtol=2e-1), (out_bf16, ref)

    print("KERNEL_OK")
</pallas_src>

<mosaic_0001>
module attributes {stable_mosaic.version = 11 : i64} {
  func.func @_embed_kernel(%arg0: i32, %arg1: memref<16x8xf32, #tpu.memory_space<vmem>>, %arg2: memref<8x32xf32, #tpu.memory_space<vmem>>, %arg3: memref<1x32xf32, #tpu.memory_space<vmem>>, %arg4: memref<16x32xf32, #tpu.memory_space<vmem>>) attributes {dimension_semantics = [#tpu.dimension_semantics<parallel>], iteration_bounds = array<i64: 1>, scalar_prefetch = 0 : i64, scratch_operands = 0 : i64, tpu.core_type = #tpu.core_type<tc>, window_params = [{transform_indices = @transform_0, window_bounds = array<i64: 16, 8>}, {pipeline_mode = #tpu.pipeline_mode<synchronous>, transform_indices = @transform_1, window_bounds = array<i64: 8, 32>}, {pipeline_mode = #tpu.pipeline_mode<synchronous>, transform_indices = @transform_2, window_bounds = array<i64: 1, 32>}, {transform_indices = @transform_3, window_bounds = array<i64: 16, 32>}]} {
    %c0 = arith.constant 0 : index
    %c0_0 = arith.constant 0 : index
    %0 = vector.load %arg1[%c0, %c0_0] : memref<16x8xf32, #tpu.memory_space<vmem>>, vector<16x8xf32>
    %c0_1 = arith.constant 0 : index
    %c0_2 = arith.constant 0 : index
    %1 = vector.load %arg2[%c0_1, %c0_2] : memref<8x32xf32, #tpu.memory_space<vmem>>, vector<8x32xf32>
    %cst = arith.constant dense<0.000000e+00> : vector<16x32xf32>
    %2 = tpu.matmul %0, %1, %cst {dimension_numbers = #tpu.dot_dimension_numbers<[1], [0], [0], [1], [0, 0, 1, 1], [], []>} : vector<16x8xf32>, vector<8x32xf32>, vector<16x32xf32> -> vector<16x32xf32>
    %c0_3 = arith.constant 0 : index
    %c0_4 = arith.constant 0 : index
    %3 = vector.load %arg3[%c0_3, %c0_4] : memref<1x32xf32, #tpu.memory_space<vmem>>, vector<1x32xf32>
    %4 = vector.broadcast %3 : vector<1x32xf32> to vector<16x32xf32>
    %5 = arith.addf %2, %4 : vector<16x32xf32>
    %c0_5 = arith.constant 0 : index
    %c0_6 = arith.constant 0 : index
    %6 = vector.load %arg4[%c0_5, %c0_6] : memref<16x32xf32, #tpu.memory_space<vmem>>, vector<16x32xf32>
    tpu.vector_store %arg4[%c0_5, %c0_6], %5 {strides = array<i32>} : memref<16x32xf32, #tpu.memory_space<vmem>>, vector<16x32xf32>,
    return
  }
  func.func @transform_0(%arg0: i32) -> (i32, i32) {
    %c0_i32 = arith.constant 0 : i32
    %c0_i32_0 = arith.constant 0 : i32
    return %arg0, %c0_i32 : i32, i32
  }
  func.func @transform_1(%arg0: i32) -> (i32, i32) {
    %c0_i32 = arith.constant 0 : i32
    %c0_i32_0 = arith.constant 0 : i32
    %c0_i32_1 = arith.constant 0 : i32
    return %c0_i32, %c0_i32_0 : i32, i32
  }
  func.func @transform_2(%arg0: i32) -> (i32, i32) {
    %c0_i32 = arith.constant 0 : i32
    %c0_i32_0 = arith.constant 0 : i32
    %c0_i32_1 = arith.constant 0 : i32
    return %c0_i32, %c0_i32_0 : i32, i32
  }
  func.func @transform_3(%arg0: i32) -> (i32, i32) {
    %c0_i32 = arith.constant 0 : i32
    %c0_i32_0 = arith.constant 0 : i32
    return %arg0, %c0_i32 : i32, i32
  }
}

module attributes {stable_mosaic.version = 11 : i64} {
  func.func @_edge_mlp_kernel(%arg0: i32, %arg1: memref<32x32xf32, #tpu.memory_space<vmem>>, %arg2: memref<32x32xf32, #tpu.memory_space<vmem>>, %arg3: memref<32x4xf32, #tpu.memory_space<vmem>>, %arg4: memref<32x32xf32, #tpu.memory_space<vmem>>, %arg5: memref<32x32xf32, #tpu.memory_space<vmem>>, %arg6: memref<4x32xf32, #tpu.memory_space<vmem>>, %arg7: memref<1x32xf32, #tpu.memory_space<vmem>>, %arg8: memref<32x32xf32, #tpu.memory_space<vmem>>, %arg9: memref<1x32xf32, #tpu.memory_space<vmem>>, %arg10: memref<32x32xf32, #tpu.memory_space<vmem>>) attributes {dimension_semantics = [#tpu.dimension_semantics<parallel>], iteration_bounds = array<i64: 1>, scalar_prefetch = 0 : i64, scratch_operands = 0 : i64, tpu.core_type = #tpu.core_type<tc>, window_params = [{transform_indices = @transform_0, window_bounds = array<i64: 32, 32>}, {transform_indices = @transform_1, window_bounds = array<i64: 32, 32>}, {transform_indices = @transform_2, window_bounds = array<i64: 32, 4>}, {pipeline_mode = #tpu.pipeline_mode<synchronous>, transform_indices = @transform_3, window_bounds = array<i64: 32, 32>}, {pipeline_mode = #tpu.pipeline_mode<synchronous>, transform_indices = @transform_4, window_bounds = array<i64: 32, 32>}, {pipeline_mode = #tpu.pipeline_mode<synchronous>, transform_indices = @transform_5, window_bounds = array<i64: 4, 32>}, {pipeline_mode = #tpu.pipeline_mode<synchronous>, transform_indices = @transform_6, window_bounds = array<i64: 1, 32>}, {pipeline_mode = #tpu.pipeline_mode<synchronous>, transform_indices = @transform_7, window_bounds = array<i64: 32, 32>}, {pipeline_mode = #tpu.pipeline_mode<synchronous>, transform_indices = @transform_8, window_bounds = array<i64: 1, 32>}, {transform_indices = @transform_9, window_bounds = array<i64: 32, 32>}]} {
    %c0 = arith.constant 0 : index
    %c0_0 = arith.constant 0 : index
    %0 = vector.load %arg1[%c0, %c0_0] : memref<32x32xf32, #tpu.memory_space<vmem>>, vector<32x32xf32>
    %c0_1 = arith.constant 0 : index
    %c0_2 = arith.constant 0 : index
    %1 = vector.load %arg4[%c0_1, %c0_2] : memref<32x32xf32, #tpu.memory_space<vmem>>, vector<32x32xf32>
    %cst = arith.constant dense<0.000000e+00> : vector<32x32xf32>
    %2 = tpu.matmul %0, %1, %cst {dimension_numbers = #tpu.dot_dimension_numbers<[1], [0], [0], [1], [0, 0, 1, 1], [], []>} : vector<32x32xf32>, vector<32x32xf32>, vector<32x32xf32> -> vector<32x32xf32>
    %c0_3 = arith.constant 0 : index
    %c0_4 = arith.constant 0 : index
    %3 = vector.load %arg2[%c0_3, %c0_4] : memref<32x32xf32, #tpu.memory_space<vmem>>, vector<32x32xf32>
    %c0_5 = arith.constant 0 : index
    %c0_6 = arith.constant 0 : index
    %4 = vector.load %arg5[%c0_5, %c0_6] : memref<32x32xf32, #tpu.memory_space<vmem>>, vector<32x32xf32>
    %cst_7 = arith.constant dense<0.000000e+00> : vector<32x32xf32>
    %5 = tpu.matmul %3, %4, %cst_7 {dimension_numbers = #tpu.dot_dimension_numbers<[1], [0], [0], [1], [0, 0, 1, 1], [], []>} : vector<32x32xf32>, vector<32x32xf32>, vector<32x32xf32> -> vector<32x32xf32>
    %6 = arith.addf %2, %5 : vector<32x32xf32>
    %c0_8 = arith.constant 0 : index
    %c0_9 = arith.constant 0 : index
    %7 = vector.load %arg3[%c0_8, %c0_9] : memref<32x4xf32, #tpu.memory_space<vmem>>, vector<32x4xf32>
    %c0_10 = arith.constant 0 : index
    %c0_11 = arith.constant 0 : index
    %8 = vector.load %arg6[%c0_10, %c0_11] : memref<4x32xf32, #tpu.memory_space<vmem>>, vector<4x32xf32>
    %cst_12 = arith.constant dense<0.000000e+00> : vector<32x32xf32>
    %9 = tpu.matmul %7, %8, %cst_12 {dimension_numbers = #tpu.dot_dimension_numbers<[1], [0], [0], [1], [0, 0, 1, 1], [], []>} : vector<32x4xf32>, vector<4x32xf32>, vector<32x32xf32> -> vector<32x32xf32>
    %10 = arith.addf %6, %9 : vector<32x32xf32>
    %c0_13 = arith.constant 0 : index
    %c0_14 = arith.constant 0 : index
    %11 = vector.load %arg7[%c0_13, %c0_14] : memref<1x32xf32, #tpu.memory_space<vmem>>, vector<1x32xf32>
    %12 = vector.broadcast %11 : vector<1x32xf32> to vector<32x32xf32>
    %13 = arith.addf %10, %12 : vector<32x32xf32>
    %14 = arith.negf %13 : vector<32x32xf32>
    %15 = math.exp %14 : vector<32x32xf32>
    %cst_15 = arith.constant 1.000000e+00 : f32
    %16 = vector.broadcast %cst_15 : f32 to vector<32x32xf32>
    %17 = arith.addf %16, %15 : vector<32x32xf32>
    %18 = arith.divf %16, %17 : vector<32x32xf32>
    %19 = arith.mulf %13, %18 : vector<32x32xf32>
    %c0_16 = arith.constant 0 : index
    %c0_17 = arith.constant 0 : index
    %20 = vector.load %arg8[%c0_16, %c0_17] : memref<32x32xf32, #tpu.memory_space<vmem>>, vector<32x32xf32>
    %cst_18 = arith.constant dense<0.000000e+00> : vector<32x32xf32>
    %21 = tpu.matmul %19, %20, %cst_18 {dimension_numbers = #tpu.dot_dimension_numbers<[1], [0], [0], [1], [0, 0, 1, 1], [], []>} : vector<32x32xf32>, vector<32x32xf32>, vector<32x32xf32> -> vector<32x32xf32>
    %c0_19 = arith.constant 0 : index
    %c0_20 = arith.constant 0 : index
    %22 = vector.load %arg9[%c0_19, %c0_20] : memref<1x32xf32, #tpu.memory_space<vmem>>, vector<1x32xf32>
    %23 = vector.broadcast %22 : vector<1x32xf32> to vector<32x32xf32>
    %24 = arith.addf %21, %23 : vector<32x32xf32>
    %25 = arith.negf %24 : vector<32x32xf32>
    %26 = math.exp %25 : vector<32x32xf32>
    %cst_21 = arith.constant 1.000000e+00 : f32
    %27 = vector.broadcast %cst_21 : f32 to vector<32x32xf32>
    %28 = arith.addf %27, %26 : vector<32x32xf32>
    %29 = arith.divf %27, %28 : vector<32x32xf32>
    %30 = arith.mulf %24, %29 : vector<32x32xf32>
    %c0_22 = arith.constant 0 : index
    %c0_23 = arith.constant 0 : index
    %31 = vector.load %arg10[%c0_22, %c0_23] : memref<32x32xf32, #tpu.memory_space<vmem>>, vector<32x32xf32>
    tpu.vector_store %arg10[%c0_22, %c0_23], %30 {strides = array<i32>} : memref<32x32xf32, #tpu.memory_space<vmem>>, vector<32x32xf32>,
    return
  }
  func.func @transform_0(%arg0: i32) -> (i32, i32) {
    %c0_i32 = arith.constant 0 : i32
    %c0_i32_0 = arith.constant 0 : i32
    return %arg0, %c0_i32 : i32, i32
  }
  func.func @transform_1(%arg0: i32) -> (i32, i32) {
    %c0_i32 = arith.constant 0 : i32
    %c0_i32_0 = arith.constant 0 : i32
    return %arg0, %c0_i32 : i32, i32
  }
  func.func @transform_2(%arg0: i32) -> (i32, i32) {
    %c0_i32 = arith.constant 0 : i32
    %c0_i32_0 = arith.constant 0 : i32
    return %arg0, %c0_i32 : i32, i32
  }
  func.func @transform_3(%arg0: i32) -> (i32, i32) {
    %c0_i32 = arith.constant 0 : i32
    %c0_i32_0 = arith.constant 0 : i32
    %c0_i32_1 = arith.constant 0 : i32
    return %c0_i32, %c0_i32_0 : i32, i32
  }
  func.func @transform_4(%arg0: i32) -> (i32, i32) {
    %c0_i32 = arith.constant 0 : i32
    %c0_i32_0 = arith.constant 0 : i32
    %c0_i32_1 = arith.constant 0 : i32
    return %c0_i32, %c0_i32_0 : i32, i32
  }
  func.func @transform_5(%arg0: i32) -> (i32, i32) {
    %c0_i32 = arith.constant 0 : i32
    %c0_i32_0 = arith.constant 0 : i32
    %c0_i32_1 = arith.constant 0 : i32
    return %c0_i32, %c0_i32_0 : i32, i32
  }
  func.func @transform_6(%arg0: i32) -> (i32, i32) {
    %c0_i32 = arith.constant 0 : i32
    %c0_i32_0 = arith.constant 0 : i32
    %c0_i32_1 = arith.constant 0 : i32
    return %c0_i32, %c0_i32_0 : i32, i32
  }
  func.func @transform_7(%arg0: i32) -> (i32, i32) {
    %c0_i32 = arith.constant 0 : i32
    %c0_i32_0 = arith.constant 0 : i32
    %c0_i32_1 = arith.constant 0 : i32
    return %c0_i32, %c0_i32_0 : i32, i32
  }
  func.func @transform_8(%arg0: i32) -> (i32, i32) {
    %c0_i32 = arith.constant 0 : i32
    %c0_i32_0 = arith.constant 0 : i32
    %c0_i32_1 = arith.constant 0 : i32
    return %c0_i32, %c0_i32_0 : i32, i32
  }
  func.func @transform_9(%arg0: i32) -> (i32, i32) {
    %c0_i32 = arith.constant 0 : i32
    %c0_i32_0 = arith.constant 0 : i32
    return %arg0, %c0_i32 : i32, i32
  }
}

module attributes {stable_mosaic.version = 11 : i64} {
  func.func @_agg_node_kernel(%arg0: i32, %arg1: i32, %arg2: memref<1x32xi32, #tpu.memory_space<vmem>>, %arg3: memref<32x32xf32, #tpu.memory_space<vmem>>, %arg4: memref<16x32xf32, #tpu.memory_space<vmem>>, %arg5: memref<32x32xf32, #tpu.memory_space<vmem>>, %arg6: memref<32x32xf32, #tpu.memory_space<vmem>>, %arg7: memref<1x32xf32, #tpu.memory_space<vmem>>, %arg8: memref<32x32xf32, #tpu.memory_space<vmem>>, %arg9: memref<1x32xf32, #tpu.memory_space<vmem>>, %arg10: memref<16x32xf32, #tpu.memory_space<vmem>>, %arg11: memref<16x32xf32, #tpu.memory_space<vmem>>) attributes {dimension_semantics = [#tpu.dimension_semantics<parallel>, #tpu.dimension_semantics<arbitrary>], iteration_bounds = array<i64: 1, 1>, scalar_prefetch = 0 : i64, scratch_operands = 1 : i64, tpu.core_type = #tpu.core_type<tc>, window_params = [{transform_indices = @transform_0, window_bounds = array<i64: 1, 32>}, {transform_indices = @transform_1, window_bounds = array<i64: 32, 32>}, {transform_indices = @transform_2, window_bounds = array<i64: 16, 32>}, {pipeline_mode = #tpu.pipeline_mode<synchronous>, transform_indices = @transform_3, window_bounds = array<i64: 32, 32>}, {pipeline_mode = #tpu.pipeline_mode<synchronous>, transform_indices = @transform_4, window_bounds = array<i64: 32, 32>}, {pipeline_mode = #tpu.pipeline_mode<synchronous>, transform_indices = @transform_5, window_bounds = array<i64: 1, 32>}, {pipeline_mode = #tpu.pipeline_mode<synchronous>, transform_indices = @transform_6, window_bounds = array<i64: 32, 32>}, {pipeline_mode = #tpu.pipeline_mode<synchronous>, transform_indices = @transform_7, window_bounds = array<i64: 1, 32>}, {transform_indices = @transform_8, window_bounds = array<i64: 16, 32>}]} {
    %c0_i32 = arith.constant 0 : i32
    %0 = arith.cmpi eq, %arg1, %c0_i32 : i32
    %1 = arith.extui %0 : i1 to i32
    %c0_i32_0 = arith.constant 0 : i32
    %2 = arith.cmpi ne, %1, %c0_i32_0 : i32
    scf.if %2 {
      %cst_10 = arith.constant 0.000000e+00 : f32
      %20 = vector.broadcast %cst_10 : f32 to vector<16x32xf32>
      %c0_11 = arith.constant 0 : index
      %c0_12 = arith.constant 0 : index
      %21 = vector.load %arg11[%c0_11, %c0_12] : memref<16x32xf32, #tpu.memory_space<vmem>>, vector<16x32xf32>
      tpu.vector_store %arg11[%c0_11, %c0_12], %20 {strides = array<i32>} : memref<16x32xf32, #tpu.memory_space<vmem>>, vector<16x32xf32>,
    } else {
    }
    %c16_i32 = arith.constant 16 : i32
    %3 = arith.muli %arg0, %c16_i32 : i32
    %4 = tpu.iota {dimensions = array<i32: 0>} : vector<16x32xi32>
    %5 = vector.broadcast %3 : i32 to vector<16x32xi32>
    %6 = arith.addi %5, %4 : vector<16x32xi32>
    %c0 = arith.constant 0 : index
    %c0_1 = arith.constant 0 : index
    %7 = vector.load %arg2[%c0, %c0_1] : memref<1x32xi32, #tpu.memory_space<vmem>>, vector<1x32xi32>
    %8 = vector.broadcast %7 : vector<1x32xi32> to vector<16x32xi32>
    %9 = arith.cmpi eq, %6, %8 : vector<16x32xi32>
    %10 = arith.extui %9 : vector<16x32xi1> to vector<16x32xi32>
    %11 = arith.sitofp %10 : vector<16x32xi32> to vector<16x32xf32>
    %c0_2 = arith.constant 0 : index
    %c0_3 = arith.constant 0 : index
    %12 = vector.load %arg11[%c0_2, %c0_3] : memref<16x32xf32, #tpu.memory_space<vmem>>, vector<16x32xf32>
    %c0_4 = arith.constant 0 : index
    %c0_5 = arith.constant 0 : index
    %13 = vector.load %arg3[%c0_4, %c0_5] : memref<32x32xf32, #tpu.memory_space<vmem>>, vector<32x32xf32>
    %cst = arith.constant dense<0.000000e+00> : vector<16x32xf32>
    %14 = tpu.matmul %11, %13, %cst {dimension_numbers = #tpu.dot_dimension_numbers<[1], [0], [0], [1], [0, 0, 1, 1], [], []>} : vector<16x32xf32>, vector<32x32xf32>, vector<16x32xf32> -> vector<16x32xf32>
    %15 = arith.addf %12, %14 : vector<16x32xf32>
    %c0_6 = arith.constant 0 : index
    %c0_7 = arith.constant 0 : index
    %16 = vector.load %arg11[%c0_6, %c0_7] : memref<16x32xf32, #tpu.memory_space<vmem>>, vector<16x32xf32>
    tpu.vector_store %arg11[%c0_6, %c0_7], %15 {strides = array<i32>} : memref<16x32xf32, #tpu.memory_space<vmem>>, vector<16x32xf32>,
    %c0_i32_8 = arith.constant 0 : i32
    %17 = arith.cmpi eq, %arg1, %c0_i32_8 : i32
    %18 = arith.extui %17 : i1 to i32
    %c0_i32_9 = arith.constant 0 : i32
    %19 = arith.cmpi ne, %18, %c0_i32_9 : i32
    scf.if %19 {
      %c0_10 = arith.constant 0 : index
      %c0_11 = arith.constant 0 : index
      %20 = vector.load %arg4[%c0_10, %c0_11] : memref<16x32xf32, #tpu.memory_space<vmem>>, vector<16x32xf32>
      %c0_12 = arith.constant 0 : index
      %c0_13 = arith.constant 0 : index
      %21 = vector.load %arg5[%c0_12, %c0_13] : memref<32x32xf32, #tpu.memory_space<vmem>>, vector<32x32xf32>
      %cst_14 = arith.constant dense<0.000000e+00> : vector<16x32xf32>
      %22 = tpu.matmul %20, %21, %cst_14 {dimension_numbers = #tpu.dot_dimension_numbers<[1], [0], [0], [1], [0, 0, 1, 1], [], []>} : vector<16x32xf32>, vector<32x32xf32>, vector<16x32xf32> -> vector<16x32xf32>
      %c0_15 = arith.constant 0 : index
      %c0_16 = arith.constant 0 : index
      %23 = vector.load %arg11[%c0_15, %c0_16] : memref<16x32xf32, #tpu.memory_space<vmem>>, vector<16x32xf32>
      %c0_17 = arith.constant 0 : index
      %c0_18 = arith.constant 0 : index
      %24 = vector.load %arg6[%c0_17, %c0_18] : memref<32x32xf32, #tpu.memory_space<vmem>>, vector<32x32xf32>
      %cst_19 = arith.constant dense<0.000000e+00> : vector<16x32xf32>
      %25 = tpu.matmul %23, %24, %cst_19 {dimension_numbers = #tpu.dot_dimension_numbers<[1], [0], [0], [1], [0, 0, 1, 1], [], []>} : vector<16x32xf32>, vector<32x32xf32>, vector<16x32xf32> -> vector<16x32xf32>
      %26 = arith.addf %22, %25 : vector<16x32xf32>
      %c0_20 = arith.constant 0 : index
      %c0_21 = arith.constant 0 : index
      %27 = vector.load %arg7[%c0_20, %c0_21] : memref<1x32xf32, #tpu.memory_space<vmem>>, vector<1x32xf32>
      %28 = vector.broadcast %27 : vector<1x32xf32> to vector<16x32xf32>
      %29 = arith.addf %26, %28 : vector<16x32xf32>
      %30 = arith.negf %29 : vector<16x32xf32>
      %31 = math.exp %30 : vector<16x32xf32>
      %cst_22 = arith.constant 1.000000e+00 : f32
      %32 = vector.broadcast %cst_22 : f32 to vector<16x32xf32>
      %33 = arith.addf %32, %31 : vector<16x32xf32>
      %34 = arith.divf %32, %33 : vector<16x32xf32>
      %35 = arith.mulf %29, %34 : vector<16x32xf32>
      %c0_23 = arith.constant 0 : index
      %c0_24 = arith.constant 0 : index
      %36 = vector.load %arg8[%c0_23, %c0_24] : memref<32x32xf32, #tpu.memory_space<vmem>>, vector<32x32xf32>
      %cst_25 = arith.constant dense<0.000000e+00> : vector<16x32xf32>
      %37 = tpu.matmul %35, %36, %cst_25 {dimension_numbers = #tpu.dot_dimension_numbers<[1], [0], [0], [1], [0, 0, 1, 1], [], []>} : vector<16x32xf32>, vector<32x32xf32>, vector<16x32xf32> -> vector<16x32xf32>
      %c0_26 = arith.constant 0 : index
      %c0_27 = arith.constant 0 : index
      %38 = vector.load %arg9[%c0_26, %c0_27] : memref<1x32xf32, #tpu.memory_space<vmem>>, vector<1x32xf32>
      %39 = vector.broadcast %38 : vector<1x32xf32> to vector<16x32xf32>
      %40 = arith.addf %37, %39 : vector<16x32xf32>
      %41 = arith.addf %20, %40 : vector<16x32xf32>
      %c0_28 = arith.constant 0 : index
      %c0_29 = arith.constant 0 : index
      %42 = vector.load %arg10[%c0_28, %c0_29] : memref<16x32xf32, #tpu.memory_space<vmem>>, vector<16x32xf32>
      tpu.vector_store %arg10[%c0_28, %c0_29], %41 {strides = array<i32>} : memref<16x32xf32, #tpu.memory_space<vmem>>, vector<16x32xf32>,
    } else {
    }
    return
  }
  func.func @transform_0(%arg0: i32, %arg1: i32) -> (i32, i32) {
    %c0_i32 = arith.constant 0 : i32
    %c0_i32_0 = arith.constant 0 : i32
    return %c0_i32, %arg1 : i32, i32
  }
  func.func @transform_1(%arg0: i32, %arg1: i32) -> (i32, i32) {
    %c0_i32 = arith.constant 0 : i32
    %c0_i32_0 = arith.constant 0 : i32
    return %arg1, %c0_i32 : i32, i32
  }
  func.func @transform_2(%arg0: i32, %arg1: i32) -> (i32, i32) {
    %c0_i32 = arith.constant 0 : i32
    %c0_i32_0 = arith.constant 0 : i32
    return %arg0, %c0_i32 : i32, i32
  }
  func.func @transform_3(%arg0: i32, %arg1: i32) -> (i32, i32) {
    %c0_i32 = arith.constant 0 : i32
    %c0_i32_0 = arith.constant 0 : i32
    %c0_i32_1 = arith.constant 0 : i32
    return %c0_i32, %c0_i32_0 : i32, i32
  }
  func.func @transform_4(%arg0: i32, %arg1: i32) -> (i32, i32) {
    %c0_i32 = arith.constant 0 : i32
    %c0_i32_0 = arith.constant 0 : i32
    %c0_i32_1 = arith.constant 0 : i32
    return %c0_i32, %c0_i32_0 : i32, i32
  }
  func.func @transform_5(%arg0: i32, %arg1: i32) -> (i32, i32) {
    %c0_i32 = arith.constant 0 : i32
    %c0_i32_0 = arith.constant 0 : i32
    %c0_i32_1 = arith.constant 0 : i32
    return %c0_i32, %c0_i32_0 : i32, i32
  }
  func.func @transform_6(%arg0: i32, %arg1: i32) -> (i32, i32) {
    %c0_i32 = arith.constant 0 : i32
    %c0_i32_0 = arith.constant 0 : i32
    %c0_i32_1 = arith.constant 0 : i32
    return %c0_i32, %c0_i32_0 : i32, i32
  }
  func.func @transform_7(%arg0: i32, %arg1: i32) -> (i32, i32) {
    %c0_i32 = arith.constant 0 : i32
    %c0_i32_0 = arith.constant 0 : i32
    %c0_i32_1 = arith.constant 0 : i32
    return %c0_i32, %c0_i32_0 : i32, i32
  }
  func.func @transform_8(%arg0: i32, %arg1: i32) -> (i32, i32) {
    %c0_i32 = arith.constant 0 : i32
    %c0_i32_0 = arith.constant 0 : i32
    return %arg0, %c0_i32 : i32, i32
  }
}

module attributes {stable_mosaic.version = 11 : i64} {
  func.func @_pool_linear_kernel(%arg0: i32, %arg1: memref<16x32xf32, #tpu.memory_space<vmem>>, %arg2: memref<32x1xf32, #tpu.memory_space<vmem>>, %arg3: memref<1x1xf32, #tpu.memory_space<vmem>>, %arg4: memref<1x1xf32, #tpu.memory_space<vmem>>, %arg5: memref<1x32xf32, #tpu.memory_space<vmem>>) attributes {dimension_semantics = [#tpu.dimension_semantics<arbitrary>], iteration_bounds = array<i64: 1>, scalar_prefetch = 0 : i64, scratch_operands = 1 : i64, tpu.core_type = #tpu.core_type<tc>, window_params = [{transform_indices = @transform_0, window_bounds = array<i64: 16, 32>}, {pipeline_mode = #tpu.pipeline_mode<synchronous>, transform_indices = @transform_1, window_bounds = array<i64: 32, 1>}, {pipeline_mode = #tpu.pipeline_mode<synchronous>, transform_indices = @transform_2, window_bounds = array<i64: 1, 1>}, {pipeline_mode = #tpu.pipeline_mode<synchronous>, transform_indices = @transform_3, window_bounds = array<i64: 1, 1>}]} {
    %c0_i32 = arith.constant 0 : i32
    %0 = arith.cmpi eq, %arg0, %c0_i32 : i32
    %1 = arith.extui %0 : i1 to i32
    %c0_i32_0 = arith.constant 0 : i32
    %2 = arith.cmpi ne, %1, %c0_i32_0 : i32
    scf.if %2 {
      %cst_9 = arith.constant 0.000000e+00 : f32
      %21 = vector.broadcast %cst_9 : f32 to vector<1x32xf32>
      %c0_10 = arith.constant 0 : index
      %c0_11 = arith.constant 0 : index
      %22 = vector.load %arg5[%c0_10, %c0_11] : memref<1x32xf32, #tpu.memory_space<vmem>>, vector<1x32xf32>
      tpu.vector_store %arg5[%c0_10, %c0_11], %21 {strides = array<i32>} : memref<1x32xf32, #tpu.memory_space<vmem>>, vector<1x32xf32>,
    } else {
    }
    %c16_i32 = arith.constant 16 : i32
    %3 = arith.muli %arg0, %c16_i32 : i32
    %4 = tpu.iota {dimensions = array<i32: 0>} : vector<16x32xi32>
    %5 = vector.broadcast %3 : i32 to vector<16x32xi32>
    %6 = arith.addi %5, %4 : vector<16x32xi32>
    %c16_i32_1 = arith.constant 16 : i32
    %7 = vector.broadcast %c16_i32_1 : i32 to vector<16x32xi32>
    %8 = arith.cmpi slt, %6, %7 : vector<16x32xi32>
    %9 = arith.extui %8 : vector<16x32xi1> to vector<16x32xi32>
    %10 = arith.sitofp %9 : vector<16x32xi32> to vector<16x32xf32>
    %c0 = arith.constant 0 : index
    %c0_2 = arith.constant 0 : index
    %11 = vector.load %arg5[%c0, %c0_2] : memref<1x32xf32, #tpu.memory_space<vmem>>, vector<1x32xf32>
    %c0_3 = arith.constant 0 : index
    %c0_4 = arith.constant 0 : index
    %12 = vector.load %arg1[%c0_3, %c0_4] : memref<16x32xf32, #tpu.memory_space<vmem>>, vector<16x32xf32>
    %13 = arith.mulf %12, %10 : vector<16x32xf32>
    %cst = arith.constant dense<0.000000e+00> : vector<32xf32>
    %14 = vector.multi_reduction <add>, %13, %cst [0] : vector<16x32xf32> to vector<32xf32>
    %15 = vector.shape_cast %14 : vector<32xf32> to vector<1x32xf32>
    %16 = arith.addf %11, %15 : vector<1x32xf32>
    %c0_5 = arith.constant 0 : index
    %c0_6 = arith.constant 0 : index
    %17 = vector.load %arg5[%c0_5, %c0_6] : memref<1x32xf32, #tpu.memory_space<vmem>>, vector<1x32xf32>
    tpu.vector_store %arg5[%c0_5, %c0_6], %16 {strides = array<i32>} : memref<1x32xf32, #tpu.memory_space<vmem>>, vector<1x32xf32>,
    %c0_i32_7 = arith.constant 0 : i32
    %18 = arith.cmpi eq, %arg0, %c0_i32_7 : i32
    %19 = arith.extui %18 : i1 to i32
    %c0_i32_8 = arith.constant 0 : i32
    %20 = arith.cmpi ne, %19, %c0_i32_8 : i32
    scf.if %20 {
      %c0_9 = arith.constant 0 : index
      %c0_10 = arith.constant 0 : index
      %21 = vector.load %arg5[%c0_9, %c0_10] : memref<1x32xf32, #tpu.memory_space<vmem>>, vector<1x32xf32>
      %cst_11 = arith.constant 6.250000e-02 : f32
      %22 = vector.broadcast %cst_11 : f32 to vector<1x32xf32>
      %23 = arith.mulf %21, %22 : vector<1x32xf32>
      %c0_12 = arith.constant 0 : index
      %c0_13 = arith.constant 0 : index
      %24 = vector.load %arg2[%c0_12, %c0_13] : memref<32x1xf32, #tpu.memory_space<vmem>>, vector<32x1xf32>
      %cst_14 = arith.constant dense<0.000000e+00> : vector<1x1xf32>
      %25 = tpu.matmul %23, %24, %cst_14 {dimension_numbers = #tpu.dot_dimension_numbers<[1], [0], [0], [1], [0, 0, 1, 1], [], []>} : vector<1x32xf32>, vector<32x1xf32>, vector<1x1xf32> -> vector<1x1xf32>
      %c0_15 = arith.constant 0 : index
      %c0_16 = arith.constant 0 : index
      %26 = vector.load %arg3[%c0_15, %c0_16] : memref<1x1xf32, #tpu.memory_space<vmem>>, vector<1x1xf32>
      %27 = arith.addf %25, %26 : vector<1x1xf32>
      %c0_17 = arith.constant 0 : index
      %c0_18 = arith.constant 0 : index
      %28 = vector.load %arg4[%c0_17, %c0_18] : memref<1x1xf32, #tpu.memory_space<vmem>>, vector<1x1xf32>
      tpu.vector_store %arg4[%c0_17, %c0_18], %27 {strides = array<i32>} : memref<1x1xf32, #tpu.memory_space<vmem>>, vector<1x1xf32>,
    } else {
    }
    return
  }
  func.func @transform_0(%arg0: i32) -> (i32, i32) {
    %c0_i32 = arith.constant 0 : i32
    %c0_i32_0 = arith.constant 0 : i32
    return %arg0, %c0_i32 : i32, i32
  }
  func.func @transform_1(%arg0: i32) -> (i32, i32) {
    %c0_i32 = arith.constant 0 : i32
    %c0_i32_0 = arith.constant 0 : i32
    %c0_i32_1 = arith.constant 0 : i32
    return %c0_i32, %c0_i32_0 : i32, i32
  }
  func.func @transform_2(%arg0: i32) -> (i32, i32) {
    %c0_i32 = arith.constant 0 : i32
    %c0_i32_0 = arith.constant 0 : i32
    %c0_i32_1 = arith.constant 0 : i32
    return %c0_i32, %c0_i32_0 : i32, i32
  }
  func.func @transform_3(%arg0: i32) -> (i32, i32) {
    %c0_i32 = arith.constant 0 : i32
    %c0_i32_0 = arith.constant 0 : i32
    %c0_i32_1 = arith.constant 0 : i32
    return %c0_i32, %c0_i32_0 : i32, i32
  }
}

</mosaic_0001>

<bundles_post_ra>
// kernel: gnn_forward.6
= control target key start
LH: loop header
LB: loop body
LE: loop exit
PB: predicated region body
PF: predicated region fallthrough
CT: control target
= control target key end

     0   :  { %vm24_vm0 = vcmask 64512   ;;  %vm106_vm1 = vcmask 261120   ;;  %s162_s1 = inlined_call_operand.vmem [shape: f32[8,32], index: 1, kind: input, shape index: {}]   ;;  %s163_s0 = inlined_call_operand.vmem [shape: f32[16,8], index: 0, kind: input, shape index: {}]   ;;  %s164_s2 = inlined_call_operand.vmem [shape: f32[1,32], index: 2, kind: input, shape index: {}]   ;;  %s165_s3 = inlined_call_operand.vmem [shape: f32[16,32], index: 3, kind: output, shape index: {}]  }
   0x1   :  { %v16_v0 = vld [vmem:[%s162_s1] sm:$0xff]  ;;  %v15_v2 = vld [vmem:[%s163_s0 + $0x8] sm:$0xff] }
   0x2   :  { %v14_v1 = vld [vmem:[%s163_s0] sm:$0xff]  ;;  %119 = vmatprep.subr.mxu0 %v16_v0 }
   0x3   :  { %121 = vmatprep.mubr.msk.f32.mxu0 %vm24_vm0, %v14_v1  ;;  %120 = vmatpush3.msra.mxu0 %v16_v0  ;;  %v113_v3 = vld [vmem:[%s164_s2] ss:$0 sm:$0xff] }
   0x4   :  { %122 = vmatmul.mubr.msk.f32.vlgmr.msra.gmra.mrb[0].mxu0 %vm24_vm0, %v15_v2 }
  0xd7   :  { %v123_v4 = vpop.f32.mrb[0].mxu0 }
  0xd8   :  { %v103_v5 = vadd.f32 %v123_v4, %v113_v3  ;;  %v97_v6 = vpop.f32.mrb[1].mxu0 }
  0xd9   :  { %v98_v7 = vadd.f32 %v113_v3, %v97_v6 }
  0xda   :  { %108 = vst.msk [vmem:[%s165_s3 + $0x8] sm:$0xff] %vm106_vm1, %v103_v5 }
  0xdb   :  { %107 = vst.msk [vmem:[%s165_s3] sm:$0xff] %vm106_vm1, %v98_v7 }

// kernel: gnn_forward.11
= control target key start
LH: loop header
LB: loop body
LE: loop exit
PB: predicated region body
PF: predicated region fallthrough
CT: control target
= control target key end

     0   :  { %s266_s0 = inlined_call_operand.vmem [shape: f32[16,32], index: 0, kind: input, shape index: {}]   ;;  %s267_s1 = inlined_call_operand.vmem [shape: f32[32,1], index: 1, kind: input, shape index: {}]   ;;  %s268_s2 = inlined_call_operand.<no memory space> [shape: f32[1,1], index: 2, kind: input, shape index: {}]   ;;  %s269_s3 = inlined_call_operand.hbm [shape: f32[1,1], index: 3, kind: output, shape index: {}]  }
   0x1   :  { %v8_v0 = vstv %s268_s2 }
   0x2   :  { %9 = vst [vmem:[#allocation3] sm:$0x1] %v8_v0 }
   0x3   :  { %v59_v1 = vld [vmem:[%s267_s1] sm:$0xff]  ;;  %v60_v2 = vld [vmem:[%s267_s1 + $0x8] sm:$0xff]  ;;  %v61_v3 = vld [vmem:[%s267_s1 + $0x10] sm:$0xff]  ;;  %vm21_vm0 = vcmask 253952   ;;  %v204_v4 = vmov 0.0|0.0   ;;  %v205_v7 = vmov 0.0  }
   0x4   :  { %170 = vmatprep.subr.bf16.mxu0 %v204_v4  ;;  %v171_v5 = vpack.c.bf16 %v60_v2, %v59_v1  ;;  %v62_v6 = vld [vmem:[%s267_s1 + $0x18] sm:$0xff]  ;;  %22 = vst.msk [vmem:[#allocation2] sm:$0x1] %vm21_vm0, %v205_v7  ;;  %v37_v8 = vld [vmem:[%s266_s0] sm:$0xff]  ;;  %v38_v9 = vld [vmem:[%s266_s0 + $0x8] sm:$0xff]  ;;  %vm41_vm1 = vcmask 261120  }
   0x5   :  { %vm206_vm2 = vmmov 0   ;;  %v42_v10 = vsel %vm41_vm1, %v37_v8, 0.0  ;;  %v43_v11 = vsel %vm41_vm1, %v38_v9, 0.0 }
   0x6   :  { %167 = vmatprep.mubr.msk.f32.mxu0 %vm206_vm2, %v205_v7 }
   0x7   :  { %10 = vsyncpa [#allocation5], 0  ;;  %172 = vmatpush3.bf16.msra.mxu0 %v171_v5  ;;  %v174_v12 = vpack.c.bf16 %v62_v6, %v61_v3  ;;  %v44_v13 = vadd.f32 %v43_v11, %v42_v10  ;;  %s207_s0 = smov [#allocation4]   ;;  %vm137_vm3 = vcmask 0  }
   0x8   :  { %173 = vmatprep.subr.bf16.mxu0 %v204_v4  ;;  %s145_s1 = sshll.u32 %s207_s0, 4  ;;  %s146_s1 = int_to_ptr.vmem [resolvable:$true] %s145_s1 }
   0x9   :  { %v45_v14 = vrot.slane %v44_v13, 4  ;;  %v63_v24 = vld [vmem:[#allocation3] sm:$0x1]  ;;  %s180_s25 = scalar_lea.vmem %s146_s1, 16  ;;  %s184_s26 = scalar_lea.vmem %s146_s1, 32 }
   0xa   :  { %p181_p0 = scmp.ne.s32.totalorder %s146_s1, %s180_s25  ;;  %p185_p1 = scmp.lt.s32.totalorder %s146_s1, %s146_s1 }
   0xb   :  { %175 = vmatpush3.bf16.msra.mxu0 %v174_v12  ;;  %v46_v15 = vadd.f32 %v45_v14, %v44_v13  ;;  %v36_v19 = vld [vmem:[#allocation2] sm:$0x1]  ;;  %p186_p2 = scmp.lt.s32.totalorder %s184_s26, %s180_s25 }
   0xd   :  { %v47_v16 = vrot.slane %v46_v15, 2  ;;  %p187_p3 = por %p186_p2, %p185_p1 }
   0xf   :  { %v48_v17 = vadd.f32 %v47_v16, %v46_v15  ;;  %p188_p4 = pnand %p187_p3, %p181_p0 }
  0x11   :  { %v49_v18 = vrot.slane %v48_v17, 1 }
  0x13   :  { %v50_v20 = vadd.f32 %v49_v18, %v48_v17 }
  0x15   :  { %v51_v21 = vadd.f32 %v50_v20, %v36_v19 }
  0x17   :  { %53 = vst.msk [vmem:[#allocation2] sm:$0x1] %vm21_vm0, %v51_v21 }
  0x1e   :  { %v57_v22 = vld [vmem:[#allocation2] sm:$0x1] }
  0x1f   :  { %v58_v23 = vmul.f32 0.0625, %v57_v22 }
  0x21   :  { %168 = vmatmul.mubr.msk.f32.vlgmr.msra.gmra.mrb[0].mxu0 %vm41_vm1, %v58_v23 }
  0xf4   :  { %v133_v25 = vpop.f32.mrb[0].mxu0 }
  0xf5   :  { %v134_v26 = vadd.f32 %v133_v25, %v63_v24  ;;  %v169_v27 = vpop.f32.mrb[1].mxu0 }
  0xf7   :  { %138 = vst.msk [vmem:[#allocation4] sm:$0x1] %vm137_vm3, %v134_v26 }
  0xf8   :  { %191 = shalt.err (!%p188_p4)
}
  0xf9   :  { %s192_s29 = scalar_lea.hbm %s269_s3, 16 }
  0xfa   :  { %p193_p5 = scmp.ne.s32.totalorder %s269_s3, %s192_s29  ;;  %p196_p6 = scmp.lt.u32.totalorder %s192_s29, %s269_s3 }
  0xfc   :  { %p198_p7 = pnand %p196_p6, %p193_p5 }
  0xfe   :  { %201 = shalt.err (!%p198_p7)
}
  0xff   :  { %148 = dma.vmem_to_hbm [thread:$0]  %s146_s1, 16, %s269_s3, [#allocation5]  }
 0x100   :  { %202 = dma.done.wait [#allocation5], 16  }
 0x101   :  { %203 = vsyncadd [#allocation5], 4294967280 }
 0x102   :  { %152 = vsyncpa [#allocation5], 1 }

// kernel: gnn_forward.8
= control target key start
LH: loop header
LB: loop body
LE: loop exit
PB: predicated region body
PF: predicated region fallthrough
CT: control target
= control target key end

     0   :  { %vm33_vm0 = vcmask 261120   ;;  %v37_v0 = vlaneseq  ;;  %v572_v4 = vmov 0.0   ;;  %s701_s1 = inlined_call_operand.vmem [shape: f32[32,32], index: 1, kind: input, shape index: {}]   ;;  %s702_s0 = inlined_call_operand.vmem [shape: s32[1,32], index: 0, kind: input, shape index: {}]   ;;  %s703_s4 = inlined_call_operand.vmem [shape: f32[32,32], index: 4, kind: input, shape index: {}]   ;;  %s704_s3 = inlined_call_operand.vmem [shape: f32[32,32], index: 3, kind: input, shape index: {}]   ;;  %s705_s2 = inlined_call_operand.vmem [shape: f32[16,32], index: 2, kind: input, shape index: {}, may-alias: {2,8}]   ;;  %s706_s6 = inlined_call_operand.vmem [shape: f32[32,32], index: 6, kind: input, shape index: {}]   ;;  %s707_s5 = inlined_call_operand.vmem [shape: f32[1,32], index: 5, kind: input, shape index: {}]   ;;  %s708_s7 = inlined_call_operand.vmem [shape: f32[1,32], index: 7, kind: input, shape index: {}]   ;;  %s709_s8 = inlined_call_operand.vmem [shape: f32[16,32], index: 8, kind: output, shape index: {}, may-alias: {2,8}]  }
   0x1   :  { %v56_v1 = vld [vmem:[%s701_s1] sm:$0xff]  ;;  %v57_v2 = vld [vmem:[%s701_s1 + $0x8] sm:$0xff]  ;;  %v58_v3 = vld [vmem:[%s701_s1 + $0x10] sm:$0xff]  ;;  %34 = vst.msk [vmem:[#allocation2] sm:$0xff] %vm33_vm0, %v572_v4 }
   0x2   :  { %35 = vst.msk [vmem:[#allocation2 + $0x8] sm:$0xff] %vm33_vm0, %v572_v4  ;;  %v529_v5 = vpack.c.bf16 %v57_v2, %v56_v1  ;;  %v59_v6 = vld [vmem:[%s701_s1 + $0x18] sm:$0xff]  ;;  %v38_v7 = vshrl.u32 %v37_v0, 7  ;;  %v446_v8 = vld [vmem:[%s702_s0] ss:$0 sm:$0xff]  ;;  %v158_v14 = vld [vmem:[%s703_s4 + $0x8] sm:$0xff] }
   0x3   :  { %v533_v9 = vpack.c.bf16 %v59_v6, %v58_v3  ;;  %v157_v13 = vld [vmem:[%s703_s4] sm:$0xff]  ;;  %v159_v16 = vld [vmem:[%s703_s4 + $0x10] sm:$0xff]  ;;  %v160_v17 = vld [vmem:[%s703_s4 + $0x18] sm:$0xff] }
   0x4   :  { %530 = vmatprep.subr.bf16.mxu0 %v529_v5  ;;  %v39_v10 = vadd.s32 8, %v38_v7  ;;  %vm48_vm1 = vcmp.eq.s32.totalorder %v38_v7, %v446_v8  ;;  %v537_v15 = vpack.c.bf16 %v158_v14, %v157_v13  ;;  %v541_v18 = vpack.c.bf16 %v160_v17, %v159_v16  ;;  %v151_v19 = vld [vmem:[%s704_s3] sm:$0xff]  ;;  %v152_v20 = vld [vmem:[%s704_s3 + $0x8] sm:$0xff]  ;;  %v153_v28 = vld [vmem:[%s704_s3 + $0x10] sm:$0xff] }
   0x5   :  { %532 = vmatpush3.bf16.msra.mxu0 %v529_v5  ;;  %v447_v11 = vsel %vm48_vm1, 1.0, %v572_v4  ;;  %v545_v21 = vpack.c.bf16 %v152_v20, %v151_v19  ;;  %v154_v29 = vld [vmem:[%s704_s3 + $0x18] sm:$0xff]  ;;  %v149_v32 = vld [vmem:[%s705_s2] sm:$0xff]  ;;  %v150_v34 = vld [vmem:[%s705_s2 + $0x8] sm:$0xff] }
   0x6   :  { %534 = vmatprep.subr.bf16.mxu0 %v533_v9  ;;  %vm49_vm2 = vcmp.eq.s32.totalorder %v39_v10, %v446_v8  ;;  %493 = vmatprep.mubr.msk.f32.mxu0 %vm33_vm0, %v447_v11  ;;  %v549_v31 = vpack.c.bf16 %v154_v29, %v153_v28  ;;  %v346_v35 = vld [vmem:[%s706_s6] sm:$0xff]  ;;  %v347_v36 = vld [vmem:[%s706_s6 + $0x8] sm:$0xff]  ;;  %v348_v38 = vld [vmem:[%s706_s6 + $0x10] sm:$0xff] }
   0x7   :  { %v448_v12 = vsel %vm49_vm2, 1.0, %v572_v4  ;;  %538 = vmatprep.subr.bf16.mxu1 %v537_v15  ;;  %v553_v37 = vpack.c.bf16 %v347_v36, %v346_v35  ;;  %v349_v39 = vld [vmem:[%s706_s6 + $0x18] sm:$0xff]  ;;  %v455_v41 = vld [vmem:[%s707_s5] ss:$0 sm:$0xff] }
   0x8   :  { %540 = vmatpush3.bf16.msra.mxu1 %v537_v15  ;;  %v54_v23 = vld [vmem:[#allocation2] sm:$0xff]  ;;  %v557_v40 = vpack.c.bf16 %v349_v39, %v348_v38 }
   0x9   :  { %536 = vmatpush3.bf16.msra.mxu0 %v533_v9  ;;  %542 = vmatprep.subr.bf16.mxu1 %v541_v18  ;;  %v55_v22 = vld [vmem:[#allocation2 + $0x8] sm:$0xff]  ;;  %v458_v56 = vld [vmem:[%s708_s7] ss:$0 sm:$0xff] }
   0xa   :  { %554 = vmatprep.subr.bf16.mxu0 %v553_v37 }
   0xc   :  { %494 = vmatmul.mubr.msk.f32.vlgmr.msra.gmra.mrb[0].mxu0 %vm33_vm0, %v448_v12  ;;  %544 = vmatpush3.bf16.msra.mxu1 %v541_v18 }
   0xd   :  { %546 = vmatprep.subr.bf16.mxu1 %v545_v21  ;;  %556 = vmatpush3.bf16.msra.mxu0 %v553_v37 }
   0xe   :  { %558 = vmatprep.subr.bf16.mxu0 %v557_v40 }
  0x11   :  { %560 = vmatpush3.bf16.msra.mxu0 %v557_v40 }
  0xdf   :  { %v495_v24 = vpop.f32.mrb[0].mxu0 }
  0xe0   :  { %v143_v25 = vadd.f32 %v495_v24, %v55_v22  ;;  %v133_v26 = vpop.f32.mrb[1].mxu0 }
  0xe1   :  { %v142_v27 = vadd.f32 %v133_v26, %v54_v23 }
  0xe2   :  { %145 = vst.msk [vmem:[#allocation2 + $0x8] sm:$0xff] %vm33_vm0, %v143_v25 }
  0xe3   :  { %144 = vst.msk [vmem:[#allocation2] sm:$0xff] %vm33_vm0, %v142_v27 }
  0xe9   :  { %v156_v33 = vld [vmem:[#allocation2 + $0x8] sm:$0xff] }
  0xea   :  { %v155_v30 = vld [vmem:[#allocation2] sm:$0xff] }
  0xeb   :  { %504 = vmatprep.mubr.msk.f32.mxu1 %vm33_vm0, %v155_v30 }
  0xec   :  { %505 = vmatmul.mubr.msk.f32.vlgmr.msra.gmra.mrb[0].mxu1 %vm33_vm0, %v156_v33 }
  0xed   :  { %548 = vmatpush3.bf16.msra.mxu1 %v545_v21  ;;  %515 = vmatprep.mubr.msk.f32.mxu1 %vm33_vm0, %v149_v32 }
  0xee   :  { %550 = vmatprep.subr.bf16.mxu1 %v549_v31 }
  0xf1   :  { %552 = vmatpush3.bf16.msra.mxu1 %v549_v31 }
  0xf4   :  { %516 = vmatmul.mubr.msk.f32.vlgmr.msra.gmra.mrb[0].mxu1 %vm33_vm0, %v150_v34 }
 0x1c7   :  { %v517_v42 = vpop.f32.mrb[0].mxu1 }
 0x1c8   :  { %v331_v43 = vadd.f32 %v517_v42, %v455_v41  ;;  %v314_v44 = vpop.f32.mrb[1].mxu1 }
 0x1c9   :  { %v330_v45 = vadd.f32 %v455_v41, %v314_v44 }
 0x1ca   :  { %v457_v46 = vmul.f32 -1.442695, %v331_v43 }
 0x1cb   :  { %v456_v47 = vmul.f32 -1.442695, %v330_v45 }
 0x1cc   :  { %564 = vpow2.f32 %v457_v46 }
 0x1cd   :  { %566 = vpow2.f32 %v456_v47 }
 0x1d6   :  { %v565_v48 = vpop.eup %564 }
 0x1d7   :  { %v567_v49 = vpop.eup %566  ;;  %v339_v50 = vadd.f32 1.0, %v565_v48 }
 0x1d8   :  { %v338_v51 = vadd.f32 1.0, %v567_v49 }
 0x1d9   :  { %568 = vrcp.f32 %v339_v50 }
 0x1da   :  { %570 = vrcp.f32 %v338_v51 }
 0x1e3   :  { %v569_v52 = vpop.eup %568 }
 0x1e4   :  { %v571_v53 = vpop.eup %570  ;;  %v345_v55 = vmul.f32 %v569_v52, %v331_v43 }
 0x1e5   :  { %v344_v54 = vmul.f32 %v571_v53, %v330_v45 }
 0x1e7   :  { %526 = vmatprep.mubr.msk.f32.mxu0 %vm33_vm0, %v344_v54 }
 0x1e8   :  { %527 = vmatmul.mubr.msk.f32.vlgmr.msra.gmra.mrb[2].mxu0 %vm33_vm0, %v345_v55 }
 0x2bb   :  { %v528_v57 = vpop.f32.mrb[2].mxu0 }
 0x2bc   :  { %v435_v58 = vadd.f32 %v528_v57, %v458_v56  ;;  %v429_v59 = vpop.f32.mrb[3].mxu0 }
 0x2bd   :  { %v430_v60 = vadd.f32 %v458_v56, %v429_v59 }
 0x2be   :  { %v439_v61 = vadd.f32 %v435_v58, %v150_v34 }
 0x2bf   :  { %v438_v62 = vadd.f32 %v430_v60, %v149_v32 }
 0x2c0   :  { %441 = vst.msk [vmem:[%s709_s8 + $0x8] sm:$0xff] %vm33_vm0, %v439_v61 }
 0x2c1   :  { %440 = vst.msk [vmem:[%s709_s8] sm:$0xff] %vm33_vm0, %v438_v62 }

// kernel: gnn_forward.7
= control target key start
LH: loop header
LB: loop body
LE: loop exit
PB: predicated region body
PF: predicated region fallthrough
CT: control target
= control target key end

     0   :  { %vm48_vm0 = vcmask 261120   ;;  %vm261_vm1 = vcmask 1043456   ;;  %vm248_vm2 = vcmask 31744   ;;  %s866_s3 = inlined_call_operand.vmem [shape: f32[32,32], index: 3, kind: input, shape index: {}]   ;;  %s867_s0 = inlined_call_operand.vmem [shape: f32[32,32], index: 0, kind: input, shape index: {}]   ;;  %s868_s4 = inlined_call_operand.vmem [shape: f32[32,32], index: 4, kind: input, shape index: {}]   ;;  %s869_s1 = inlined_call_operand.vmem [shape: f32[32,32], index: 1, kind: input, shape index: {}]   ;;  %s870_s5 = inlined_call_operand.vmem [shape: f32[4,32], index: 5, kind: input, shape index: {}]   ;;  %s871_s2 = inlined_call_operand.vmem [shape: f32[32,4], index: 2, kind: input, shape index: {}]   ;;  %s872_s7 = inlined_call_operand.vmem [shape: f32[32,32], index: 7, kind: input, shape index: {}]   ;;  %s873_s6 = inlined_call_operand.vmem [shape: f32[1,32], index: 6, kind: input, shape index: {}]   ;;  %s874_s8 = inlined_call_operand.vmem [shape: f32[1,32], index: 8, kind: input, shape index: {}]   ;;  %s875_s9 = inlined_call_operand.vmem [shape: f32[32,32], index: 9, kind: output, shape index: {}]  }
   0x1   :  { %v36_v0 = vld [vmem:[%s866_s3] sm:$0xff]  ;;  %v37_v1 = vld [vmem:[%s866_s3 + $0x8] sm:$0xff]  ;;  %v38_v2 = vld [vmem:[%s866_s3 + $0x10] sm:$0xff] }
   0x2   :  { %v651_v3 = vpack.c.bf16 %v37_v1, %v36_v0  ;;  %v39_v4 = vld [vmem:[%s866_s3 + $0x18] sm:$0xff]  ;;  %v32_v5 = vld [vmem:[%s867_s0] sm:$0xff]  ;;  %v45_v8 = vld [vmem:[%s868_s4 + $0x8] sm:$0xff] }
   0x3   :  { %v44_v6 = vld [vmem:[%s868_s4] sm:$0xff]  ;;  %v655_v7 = vpack.c.bf16 %v39_v4, %v38_v2  ;;  %615 = vmatprep.mubr.msk.f32.mxu0 %vm48_vm0, %v32_v5  ;;  %v46_v10 = vld [vmem:[%s868_s4 + $0x10] sm:$0xff]  ;;  %v47_v11 = vld [vmem:[%s868_s4 + $0x18] sm:$0xff] }
   0x4   :  { %652 = vmatprep.subr.bf16.mxu0 %v651_v3  ;;  %v643_v9 = vpack.c.bf16 %v45_v8, %v44_v6  ;;  %v647_v12 = vpack.c.bf16 %v47_v11, %v46_v10  ;;  %v40_v13 = vld [vmem:[%s869_s1] sm:$0xff]  ;;  %v33_v15 = vld [vmem:[%s867_s0 + $0x8] sm:$0xff]  ;;  %v34_v16 = vld [vmem:[%s867_s0 + $0x10] sm:$0xff] }
   0x5   :  { %654 = vmatpush3.bf16.msra.mxu0 %v651_v3  ;;  %v247_v14 = vld [vmem:[%s870_s5] sm:$0xf]  ;;  %601 = vmatprep.mubr.msk.f32.mxu1 %vm48_vm0, %v40_v13  ;;  %v41_v17 = vld [vmem:[%s869_s1 + $0x8] sm:$0xff]  ;;  %v42_v18 = vld [vmem:[%s869_s1 + $0x10] sm:$0xff] }
   0x6   :  { %656 = vmatprep.subr.bf16.mxu0 %v655_v7  ;;  %644 = vmatprep.subr.bf16.mxu1 %v643_v9  ;;  %v35_v19 = vld [vmem:[%s867_s0 + $0x18] sm:$0xff]  ;;  %v243_v20 = vld [vmem:[%s871_s2] sm:$0xff]  ;;  %v244_v22 = vld [vmem:[%s871_s2 + $0x8] sm:$0xff] }
   0x7   :  { %646 = vmatpush3.bf16.msra.mxu1 %v643_v9  ;;  %v43_v21 = vld [vmem:[%s869_s1 + $0x18] sm:$0xff]  ;;  %v245_v23 = vld [vmem:[%s871_s2 + $0x10] sm:$0xff]  ;;  %v393_v25 = vld [vmem:[%s872_s7] sm:$0xff] }
   0x8   :  { %648 = vmatprep.subr.bf16.mxu1 %v647_v12  ;;  %v246_v24 = vld [vmem:[%s871_s2 + $0x18] sm:$0xff]  ;;  %v394_v26 = vld [vmem:[%s872_s7 + $0x8] sm:$0xff]  ;;  %v395_v28 = vld [vmem:[%s872_s7 + $0x10] sm:$0xff] }
   0x9   :  { %658 = vmatpush3.bf16.msra.mxu0 %v655_v7  ;;  %v659_v27 = vpack.c.bf16 %v394_v26, %v393_v25  ;;  %v396_v29 = vld [vmem:[%s872_s7 + $0x18] sm:$0xff]  ;;  %v550_v36 = vld [vmem:[%s873_s6] ss:$0 sm:$0xff] }
   0xa   :  { %621 = vmatprep.subr.msk.mxu0 %vm261_vm1, %v247_v14  ;;  %v663_v30 = vpack.c.bf16 %v396_v29, %v395_v28  ;;  %v555_v4 = vld [vmem:[%s874_s8] ss:$0 sm:$0xff] }
   0xb   :  { %650 = vmatpush3.bf16.msra.mxu1 %v647_v12 }
   0xc   :  { %616 = vmatmul.mubr.msk.f32.vlgmr.msra.gmra.mrb[0].mxu0 %vm48_vm0, %v33_v15  ;;  %660 = vmatprep.subr.bf16.mxu1 %v659_v27 }
   0xd   :  { %622 = vmatpush3.msk.msra.mxu0 %vm261_vm1, %v247_v14  ;;  %618 = vmatprep.mubr.msk.f32.mxu0 %vm48_vm0, %v34_v16 }
   0xe   :  { %602 = vmatmul.mubr.msk.f32.vlgmr.msra.gmra.mrb[0].mxu1 %vm48_vm0, %v41_v17 }
   0xf   :  { %604 = vmatprep.mubr.msk.f32.mxu1 %vm48_vm0, %v42_v18  ;;  %662 = vmatpush3.bf16.msra.mxu1 %v659_v27 }
  0x10   :  { %619 = vmatmul.mubr.msk.f32.gmra.mrb[2].mxu0 %vm48_vm0, %v35_v19  ;;  %664 = vmatprep.subr.bf16.mxu1 %v663_v30 }
  0x11   :  { %623 = vmatprep.mubr.msk.f32.mxu0 %vm248_vm2, %v243_v20 }
  0x12   :  { %605 = vmatmul.mubr.msk.f32.gmra.mrb[2].mxu1 %vm48_vm0, %v43_v21 }
  0x13   :  { %666 = vmatpush3.bf16.msra.mxu1 %v663_v30 }
  0x14   :  { %624 = vmatmul.mubr.msk.f32.vlgmr.msra.gmra.mrb[0].mxu0 %vm248_vm2, %v244_v22 }
  0x15   :  { %626 = vmatprep.mubr.msk.f32.mxu0 %vm248_vm2, %v245_v23 }
  0x18   :  { %627 = vmatmul.mubr.msk.f32.gmra.mrb[2].mxu0 %vm248_vm2, %v246_v24 }
  0xe1   :  { %v603_v31 = vpop.f32.mrb[0].mxu1 }
  0xe2   :  { %v127_v32 = vpop.f32.mrb[1].mxu1 }
  0xe5   :  { %v606_v33 = vpop.f32.mrb[2].mxu1 }
  0xe6   :  { %v137_v34 = vpop.f32.mrb[3].mxu1 }
  0xe7   :  { %v625_v35 = vpop.f32.mrb[0].mxu0 }
  0xe8   :  { %v667_v37 = vadd.f32 %v625_v35, %v603_v31  ;;  %v331_v38 = vpop.f32.mrb[1].mxu0 }
  0xe9   :  { %v668_v39 = vadd.f32 %v331_v38, %v127_v32 }
  0xea   :  { %v362_v40 = vadd.f32 %v667_v37, %v550_v36 }
  0xeb   :  { %v361_v41 = vadd.f32 %v668_v39, %v550_v36  ;;  %v628_v42 = vpop.f32.mrb[2].mxu0 }
  0xec   :  { %v552_v43 = vmul.f32 -1.442695, %v362_v40  ;;  %v669_v44 = vadd.f32 %v628_v42, %v606_v33  ;;  %v341_v45 = vpop.f32.mrb[3].mxu0 }
  0xed   :  { %v551_v46 = vmul.f32 -1.442695, %v361_v41  ;;  %v670_v47 = vadd.f32 %v341_v45, %v137_v34 }
  0xee   :  { %675 = vpow2.f32 %v552_v43  ;;  %v364_v48 = vadd.f32 %v669_v44, %v550_v36 }
  0xef   :  { %677 = vpow2.f32 %v551_v46  ;;  %v363_v49 = vadd.f32 %v670_v47, %v550_v36 }
  0xf0   :  { %v554_v50 = vmul.f32 -1.442695, %v364_v48 }
  0xf1   :  { %v553_v51 = vmul.f32 -1.442695, %v363_v49 }
  0xf2   :  { %679 = vpow2.f32 %v554_v50 }
  0xf3   :  { %681 = vpow2.f32 %v553_v51 }
  0xf8   :  { %v676_v52 = vpop.eup %675 }
  0xf9   :  { %v678_v53 = vpop.eup %677  ;;  %v378_v54 = vadd.f32 1.0, %v676_v52 }
  0xfa   :  { %v377_v55 = vadd.f32 1.0, %v678_v53 }
  0xfb   :  { %683 = vrcp.f32 %v378_v54 }
  0xfc   :  { %v680_v56 = vpop.eup %679  ;;  %685 = vrcp.f32 %v377_v55 }
  0xfd   :  { %v682_v57 = vpop.eup %681  ;;  %v380_v58 = vadd.f32 1.0, %v680_v56 }
  0xfe   :  { %v379_v59 = vadd.f32 1.0, %v682_v57 }
  0xff   :  { %687 = vrcp.f32 %v380_v58 }
 0x100   :  { %689 = vrcp.f32 %v379_v59 }
 0x105   :  { %v684_v60 = vpop.eup %683 }
 0x106   :  { %v686_v61 = vpop.eup %685  ;;  %v390_v63 = vmul.f32 %v684_v60, %v362_v40 }
 0x107   :  { %v389_v62 = vmul.f32 %v686_v61, %v361_v41 }
 0x109   :  { %v688_v0 = vpop.eup %687  ;;  %637 = vmatprep.mubr.msk.f32.mxu1 %vm48_vm0, %v389_v62 }
 0x10a   :  { %v690_v1 = vpop.eup %689  ;;  %638 = vmatmul.mubr.msk.f32.vlgmr.msra.gmra.mrb[4].mxu1 %vm48_vm0, %v390_v63  ;;  %v392_v3 = vmul.f32 %v688_v0, %v364_v48 }
 0x10b   :  { %v391_v2 = vmul.f32 %v690_v1, %v363_v49 }
 0x10d   :  { %640 = vmatprep.mubr.msk.f32.mxu1 %vm48_vm0, %v391_v2 }
 0x10e   :  { %641 = vmatmul.mubr.msk.f32.gmra.mrb[6].mxu1 %vm48_vm0, %v392_v3 }
 0x1dd   :  { %v639_v5 = vpop.f32.mrb[4].mxu1 }
 0x1de   :  { %v488_v6 = vadd.f32 %v639_v5, %v555_v4  ;;  %v482_v7 = vpop.f32.mrb[5].mxu1 }
 0x1df   :  { %v483_v8 = vadd.f32 %v555_v4, %v482_v7 }
 0x1e0   :  { %v561_v9 = vmul.f32 -1.442695, %v488_v6 }
 0x1e1   :  { %v560_v10 = vmul.f32 -1.442695, %v483_v8  ;;  %v642_v11 = vpop.f32.mrb[6].mxu1 }
 0x1e2   :  { %691 = vpow2.f32 %v561_v9  ;;  %v498_v12 = vadd.f32 %v642_v11, %v555_v4  ;;  %v492_v13 = vpop.f32.mrb[7].mxu1 }
 0x1e3   :  { %693 = vpow2.f32 %v560_v10  ;;  %v493_v14 = vadd.f32 %v555_v4, %v492_v13 }
 0x1e4   :  { %v563_v15 = vmul.f32 -1.442695, %v498_v12 }
 0x1e5   :  { %v562_v16 = vmul.f32 -1.442695, %v493_v14 }
 0x1e6   :  { %695 = vpow2.f32 %v563_v15 }
 0x1e7   :  { %697 = vpow2.f32 %v562_v16 }
 0x1ec   :  { %v692_v17 = vpop.eup %691 }
 0x1ed   :  { %v694_v18 = vpop.eup %693  ;;  %v514_v19 = vadd.f32 1.0, %v692_v17 }
 0x1ee   :  { %v513_v20 = vadd.f32 1.0, %v694_v18 }
 0x1ef   :  { %699 = vrcp.f32 %v514_v19 }
 0x1f0   :  { %v696_v21 = vpop.eup %695  ;;  %701 = vrcp.f32 %v513_v20 }
 0x1f1   :  { %v698_v22 = vpop.eup %697  ;;  %v516_v23 = vadd.f32 1.0, %v696_v21 }
 0x1f2   :  { %v515_v24 = vadd.f32 1.0, %v698_v22 }
 0x1f3   :  { %703 = vrcp.f32 %v516_v23 }
 0x1f4   :  { %705 = vrcp.f32 %v515_v24 }
 0x1f9   :  { %v700_v25 = vpop.eup %699 }
 0x1fa   :  { %v702_v26 = vpop.eup %701  ;;  %v526_v27 = vmul.f32 %v700_v25, %v488_v6 }
 0x1fb   :  { %v525_v28 = vmul.f32 %v702_v26, %v483_v8 }
 0x1fc   :  { %530 = vst.msk [vmem:[%s875_s9 + $0x8] sm:$0xff] %vm48_vm0, %v526_v27 }
 0x1fd   :  { %v704_v29 = vpop.eup %703  ;;  %529 = vst.msk [vmem:[%s875_s9] sm:$0xff] %vm48_vm0, %v525_v28 }
 0x1fe   :  { %v706_v30 = vpop.eup %705  ;;  %v528_v31 = vmul.f32 %v704_v29, %v498_v12 }
 0x1ff   :  { %v527_v32 = vmul.f32 %v706_v30, %v493_v14 }
 0x200   :  { %532 = vst.msk [vmem:[%s875_s9 + $0x18] sm:$0xff] %vm48_vm0, %v528_v31 }
 0x201   :  { %531 = vst.msk [vmem:[%s875_s9 + $0x10] sm:$0xff] %vm48_vm0, %v527_v32 }

</bundles_post_ra>
